<compile_context>
chip_gen: v7x
topology: tpu7x:2x2x1
jax: 0.10.0
libtpu: 0.0.40
codegen_flags: <defaults>
</compile_context>

<pallas_src>
import functools

import jax
import jax.numpy as jnp
from jax.experimental import pallas as pl
from jax.experimental.pallas import tpu as pltpu

_MiB = 1 << 20
_FUSED_VMEM_BUDGET = 40 * _MiB    # stay well under v7x's 64 MiB physical VMEM
_NB_BLOCK_BUDGET = 2 * _MiB       # max bytes of x per fused grid step when batching N
_TILE_VMEM_BUDGET = 2 * _MiB      # per-block budget for the two-pass path


# --------------------------------------------------------------------------
# Fused single-pass kernel: pool + excite + scale for NB images per grid step.
# --------------------------------------------------------------------------
def _fused_kernel(x_ref, w1_ref, b1_ref, w2_ref, b2_ref, o_ref, *, inv_hw, nb):
    # x_ref/o_ref: (NB, C, HW)  w1_ref: (Cr, C)  b1_ref: (Cr, 1)
    # w2_ref: (C, Cr)           b2_ref: (C, 1)
    for n in range(nb):                                        # NB is small & static
        x = x_ref[n]                                           # (C, HW), native dtype

        # Squeeze: lane (spatial) reduction with f32 accumulation; the gate stays a
        # (C, 1) column so the channel axis never leaves the sublane dimension.
        pooled = jnp.sum(x, axis=-1, keepdims=True, dtype=jnp.float32) * inv_hw

        # Excitation: two tiny matmuls on the (C, 1) column (untransposed weights).
        h = jnp.dot(w1_ref[...], pooled,
                    preferred_element_type=jnp.float32) + b1_ref[...]
        h = jnp.maximum(h, 0.0)                                # (Cr, 1)
        s = jnp.dot(w2_ref[...], h,
                    preferred_element_type=jnp.float32) + b2_ref[...]
        s = jax.nn.sigmoid(s)                                  # (C, 1)

        # Scale: per-sublane lane-splat broadcast, multiply in x's native dtype.
        o_ref[n] = x * s.astype(o_ref.dtype)


# --------------------------------------------------------------------------
# Two-pass fallback, pass A: global average pool over spatial tiles.
# The f32 output block is resident across the reduction axis (P3 accumulator).
# --------------------------------------------------------------------------
def _pool_kernel(x_ref, pooled_ref, *, inv_hw):
    # x_ref: (1, C, tHW)  pooled_ref: (1, C, 1) f32
    t = pl.program_id(1)

    @pl.when(t == 0)
    def _init():
        pooled_ref[...] = jnp.zeros_like(pooled_ref)

    pooled_ref[0] += jnp.sum(x_ref[0], axis=-1, keepdims=True, dtype=jnp.float32)

    @pl.when(t == pl.num_programs(1) - 1)
    def _finalize():
        pooled_ref[...] = pooled_ref[...] * inv_hw


# --------------------------------------------------------------------------
# Two-pass fallback, pass B: apply the precomputed per-channel gate.
# --------------------------------------------------------------------------
def _scale_kernel(s_ref, x_ref, o_ref):
    # s_ref: (1, C, 1) f32 gate, x_ref/o_ref: (1, C, tHW) native dtype
    o_ref[0] = x_ref[0] * s_ref[0].astype(o_ref.dtype)


def _pick_hw_tile(C, HW, itemsize):
    """Largest multiple of 128 dividing HW with C*tHW*itemsize <= tile budget."""
    if HW % 128 != 0:
        # TODO(synk): ragged spatial tiling (HW not a multiple of 128) would need
        # masked partial blocks; fall back to whole-HW blocks in that case.
        return HW
    best = 128
    t = 128
    while t <= HW:
        if HW % t == 0 and C * t * itemsize <= _TILE_VMEM_BUDGET:
            best = t
        t += 128
    return best


def _pick_batch_tile(N, per_image_bytes):
    """Largest divisor of N (<= 8) whose x block stays under the NB budget."""
    for d in range(min(N, 8), 0, -1):
        if N % d == 0 and d * per_image_bytes <= _NB_BLOCK_BUDGET:
            return d
    return 1


def sqex_pallas(x, w1, b1, w2, b2, *, force_two_pass=False, hw_tile=None):
    """Squeeze-and-Excitation forward.

    x: (N, C, H, W).  w1: (Cr, C), b1: (Cr,), w2: (C, Cr), b2: (C,)
    (PyTorch nn.Linear weight layout).
    """
    N, C, H, W = x.shape
    Cr = w1.shape[0]
    HW = H * W
    itemsize = x.dtype.itemsize

    x_flat = x.reshape(N, C, HW)
    w1f = w1.astype(jnp.float32)                  # (Cr, C), used untransposed
    w2f = w2.astype(jnp.float32)                  # (C, Cr), used untransposed
    b1c = b1.reshape(Cr, 1).astype(jnp.float32)   # column biases: channel on sublanes
    b2c = b2.reshape(C, 1).astype(jnp.float32)

    weight_bytes = (2 * Cr * C + Cr + C) * 4
    per_image_bytes = C * HW * itemsize

    # Batch NB small images per fused grid step to amortize per-step overhead.
    nb = _pick_batch_tile(N, per_image_bytes)
    # Fused working set: double-buffered x block + double-buffered out block
    # + resident weights (+ headroom for in-kernel temporaries, added below).
    fused_bytes = 2 * 2 * nb * per_image_bytes + 2 * weight_bytes

    # Prefer the two-pass layout when the fused whole-image block cannot fit the
    # VMEM budget, or when the batch grid is too short to pipeline large
    # whole-image DMAs (v7x splits grid=(N,) across 2 TensorCores).
    two_pass = (
        force_two_pass
        or fused_bytes > _FUSED_VMEM_BUDGET
        or (N < 4 and per_image_bytes > 4 * _MiB and HW % 128 == 0)
    )

    if not two_pass:
        vmem_limit = int(min(max(fused_bytes + nb * per_image_bytes + 8 * _MiB,
                                 32 * _MiB), 56 * _MiB))
        out_flat = pl.pallas_call(
            functools.partial(_fused_kernel, inv_hw=1.0 / HW, nb=nb),
            out_shape=jax.ShapeDtypeStruct((N, C, HW), x.dtype),
            grid_spec=pltpu.PrefetchScalarGridSpec(
                num_scalar_prefetch=0,
                grid=(N // nb,),
                in_specs=[
                    pl.BlockSpec((nb, C, HW), lambda n: (n, 0, 0)),  # x, NB images
                    pl.BlockSpec((Cr, C), lambda n: (0, 0)),         # W1 (resident)
                    pl.BlockSpec((Cr, 1), lambda n: (0, 0)),         # b1
                    pl.BlockSpec((C, Cr), lambda n: (0, 0)),         # W2 (resident)
                    pl.BlockSpec((C, 1), lambda n: (0, 0)),          # b2
                ],
                out_specs=pl.BlockSpec((nb, C, HW), lambda n: (n, 0, 0)),
            ),
            compiler_params=pltpu.CompilerParams(
                dimension_semantics=("parallel",),
                vmem_limit_bytes=vmem_limit,
            ),
            cost_estimate=pl.CostEstimate(
                flops=int(N * (2 * C * HW + 4 * C * Cr)),
                transcendentals=int(N * C),
                bytes_accessed=int(2 * N * C * HW * itemsize + weight_bytes),
            ),
        )(x_flat, w1f, b1c, w2f, b2c)
        return out_flat.reshape(N, C, H, W)

    # ---------------- two-pass fallback ----------------
    tHW = hw_tile if hw_tile is not None else _pick_hw_tile(C, HW, itemsize)
    assert HW % tHW == 0, "hw_tile must evenly divide H*W"
    n_t = HW // tHW

    # Pass A: tiled global average pool -> pooled (N, C, 1) in f32.
    pooled = pl.pallas_call(
        functools.partial(_pool_kernel, inv_hw=1.0 / HW),
        out_shape=jax.ShapeDtypeStruct((N, C, 1), jnp.float32),
        grid_spec=pltpu.PrefetchScalarGridSpec(
            num_scalar_prefetch=0,
            grid=(N, n_t),
            in_specs=[pl.BlockSpec((1, C, tHW), lambda n, t: (n, 0, t))],
            out_specs=pl.BlockSpec((1, C, 1), lambda n, t: (n, 0, 0)),
        ),
        compiler_params=pltpu.CompilerParams(
            dimension_semantics=("parallel", "arbitrary"),
            vmem_limit_bytes=int(
                min(max(4 * C * tHW * itemsize + 8 * _MiB, 32 * _MiB), 56 * _MiB)),
        ),
        cost_estimate=pl.CostEstimate(
            flops=int(N * C * HW),
            transcendentals=0,
            bytes_accessed=int(N * C * HW * itemsize + N * C * 4),
        ),
    )(x_flat)

    # Excitation: negligible FLOPs -- one batched (N,C)x(C,Cr) matmul in XLA
    # instead of N separate M=1 MXU calls inside a kernel.
    p = pooled[:, :, 0]                                        # (N, C) f32
    h = jnp.maximum(p @ w1f.T + b1.astype(jnp.float32), 0.0)   # (N, Cr)
    s = jax.nn.sigmoid(h @ w2f.T + b2.astype(jnp.float32))     # (N, C)
    s = s[:, :, None]                                          # (N, C, 1) f32

    # Pass B: per-channel scaling streamed over lane-dense (C, tHW) tiles.
    out_flat = pl.pallas_call(
        _scale_kernel,
        out_shape=jax.ShapeDtypeStruct((N, C, HW), x.dtype),
        grid_spec=pltpu.PrefetchScalarGridSpec(
            num_scalar_prefetch=0,
            grid=(N, n_t),
            in_specs=[
                pl.BlockSpec((1, C, 1), lambda n, t: (n, 0, 0)),     # gate (resident per n)
                pl.BlockSpec((1, C, tHW), lambda n, t: (n, 0, t)),   # x tile
            ],
            out_specs=pl.BlockSpec((1, C, tHW), lambda n, t: (n, 0, t)),
        ),
        compiler_params=pltpu.CompilerParams(
            dimension_semantics=("parallel", "parallel"),
            vmem_limit_bytes=int(
                min(max(8 * C * tHW * itemsize + 8 * _MiB, 32 * _MiB), 56 * _MiB)),
        ),
        cost_estimate=pl.CostEstimate(
            flops=int(N * C * HW),
            transcendentals=0,
            bytes_accessed=int(2 * N * C * HW * itemsize),
        ),
    )(s, x_flat)
    return out_flat.reshape(N, C, H, W)


def sqex_ref(x, w1, b1, w2, b2):
    """Plain-JAX reference mirroring the PyTorch forward."""
    pooled = jnp.mean(x, axis=(2, 3))                  # (N, C)
    h = jnp.maximum(pooled @ w1.T + b1, 0.0)           # (N, Cr)
    s = jax.nn.sigmoid(h @ w2.T + b2)                  # (N, C)
    return x * s[:, :, None, None]


if __name__ == "__main__":
    # Small shapes consistent with the module: n_features=C divisible by reduction=16.
    N, C, H, W = 2, 32, 16, 16
    reduction = 16
    Cr = C // reduction

    key = jax.random.PRNGKey(0)
    kx, kw1, kb1, kw2, kb2 = jax.random.split(key, 5)

    x = jax.random.normal(kx, (N, C, H, W), dtype=jnp.float32)
    # Deterministic "nn.Linear"-style params (synthetic, not a checkpoint).
    w1 = jax.random.normal(kw1, (Cr, C), dtype=jnp.float32) * 0.1   # linear1.weight
    b1 = jax.random.normal(kb1, (Cr,), dtype=jnp.float32) * 0.1     # linear1.bias
    w2 = jax.random.normal(kw2, (C, Cr), dtype=jnp.float32) * 0.1   # linear2.weight
    b2 = jax.random.normal(kb2, (C,), dtype=jnp.float32) * 0.1      # linear2.bias

    ref = sqex_ref(x, w1, b1, w2, b2)

    # Fused single-pass path (both images fit one VMEM block -> NB=2, grid=(1,)).
    out_fused = sqex_pallas(x, w1, b1, w2, b2)
    jax.block_until_ready(out_fused)
    assert out_fused.shape == (N, C, H, W)
    assert jnp.allclose(out_fused, ref, atol=1e-5, rtol=1e-5), "fused mismatch"

    # Two-pass fallback (tiled pool/excite + tiled scale), forced for coverage
    # with 2 spatial tiles so the accumulator init/finalize path executes.
    out_two = sqex_pallas(x, w1, b1, w2, b2, force_two_pass=True, hw_tile=128)
    jax.block_until_ready(out_two)
    assert jnp.allclose(out_two, ref, atol=1e-5, rtol=1e-5), "two-pass mismatch"

    print("KERNEL_OK")
</pallas_src>

<mosaic_0001>
module attributes {stable_mosaic.version = 11 : i64} {
  func.func @_fused_kernel(%arg0: i32, %arg1: memref<2x32x256xf32, #tpu.memory_space<vmem>>, %arg2: memref<2x32xf32, #tpu.memory_space<vmem>>, %arg3: memref<2x1xf32, #tpu.memory_space<vmem>>, %arg4: memref<32x2xf32, #tpu.memory_space<vmem>>, %arg5: memref<32x1xf32, #tpu.memory_space<vmem>>, %arg6: memref<2x32x256xf32, #tpu.memory_space<vmem>>) attributes {dimension_semantics = [#tpu.dimension_semantics<parallel>], iteration_bounds = array<i64: 1>, scalar_prefetch = 0 : i64, scratch_operands = 0 : i64, tpu.core_type = #tpu.core_type<tc>, window_params = [{transform_indices = @transform_0, window_bounds = array<i64: 2, 32, 256>}, {pipeline_mode = #tpu.pipeline_mode<synchronous>, transform_indices = @transform_1, window_bounds = array<i64: 2, 32>}, {pipeline_mode = #tpu.pipeline_mode<synchronous>, transform_indices = @transform_2, window_bounds = array<i64: 2, 1>}, {pipeline_mode = #tpu.pipeline_mode<synchronous>, transform_indices = @transform_3, window_bounds = array<i64: 32, 2>}, {pipeline_mode = #tpu.pipeline_mode<synchronous>, transform_indices = @transform_4, window_bounds = array<i64: 32, 1>}, {transform_indices = @transform_5, window_bounds = array<i64: 2, 32, 256>}]} {
    %c0 = arith.constant 0 : index
    %c0_0 = arith.constant 0 : index
    %c0_1 = arith.constant 0 : index
    %0 = vector.load %arg1[%c0, %c0_0, %c0_1] : memref<2x32x256xf32, #tpu.memory_space<vmem>>, vector<1x32x256xf32>
    %1 = vector.shape_cast %0 : vector<1x32x256xf32> to vector<32x256xf32>
    %cst = arith.constant dense<0.000000e+00> : vector<32xf32>
    %2 = vector.multi_reduction <add>, %1, %cst [1] : vector<32x256xf32> to vector<32xf32>
    %3 = vector.shape_cast %2 : vector<32xf32> to vector<32x1xf32>
    %cst_2 = arith.constant 3.906250e-03 : f32
    %4 = vector.broadcast %cst_2 : f32 to vector<32x1xf32>
    %5 = arith.mulf %3, %4 : vector<32x1xf32>
    %c0_3 = arith.constant 0 : index
    %c0_4 = arith.constant 0 : index
    %6 = vector.load %arg2[%c0_3, %c0_4] : memref<2x32xf32, #tpu.memory_space<vmem>>, vector<2x32xf32>
    %cst_5 = arith.constant dense<0.000000e+00> : vector<2x1xf32>
    %7 = tpu.matmul %6, %5, %cst_5 {dimension_numbers = #tpu.dot_dimension_numbers<[1], [0], [0], [1], [0, 0, 1, 1], [], []>} : vector<2x32xf32>, vector<32x1xf32>, vector<2x1xf32> -> vector<2x1xf32>
    %c0_6 = arith.constant 0 : index
    %c0_7 = arith.constant 0 : index
    %8 = vector.load %arg3[%c0_6, %c0_7] : memref<2x1xf32, #tpu.memory_space<vmem>>, vector<2x1xf32>
    %9 = arith.addf %7, %8 : vector<2x1xf32>
    %cst_8 = arith.constant 0.000000e+00 : f32
    %10 = vector.broadcast %cst_8 : f32 to vector<2x1xf32>
    %11 = arith.maximumf %9, %10 : vector<2x1xf32>
    %c0_9 = arith.constant 0 : index
    %c0_10 = arith.constant 0 : index
    %12 = vector.load %arg4[%c0_9, %c0_10] : memref<32x2xf32, #tpu.memory_space<vmem>>, vector<32x2xf32>
    %cst_11 = arith.constant dense<0.000000e+00> : vector<32x1xf32>
    %13 = tpu.matmul %12, %11, %cst_11 {dimension_numbers = #tpu.dot_dimension_numbers<[1], [0], [0], [1], [0, 0, 1, 1], [], []>} : vector<32x2xf32>, vector<2x1xf32>, vector<32x1xf32> -> vector<32x1xf32>
    %c0_12 = arith.constant 0 : index
    %c0_13 = arith.constant 0 : index
    %14 = vector.load %arg5[%c0_12, %c0_13] : memref<32x1xf32, #tpu.memory_space<vmem>>, vector<32x1xf32>
    %15 = arith.addf %13, %14 : vector<32x1xf32>
    %16 = arith.negf %15 : vector<32x1xf32>
    %17 = math.exp %16 : vector<32x1xf32>
    %cst_14 = arith.constant 1.000000e+00 : f32
    %18 = vector.broadcast %cst_14 : f32 to vector<32x1xf32>
    %19 = arith.addf %18, %17 : vector<32x1xf32>
    %20 = arith.divf %18, %19 : vector<32x1xf32>
    %21 = vector.broadcast %20 : vector<32x1xf32> to vector<32x256xf32>
    %22 = arith.mulf %1, %21 : vector<32x256xf32>
    %c0_15 = arith.constant 0 : index
    %c0_16 = arith.constant 0 : index
    %c0_17 = arith.constant 0 : index
    %23 = vector.load %arg6[%c0_15, %c0_16, %c0_17] : memref<2x32x256xf32, #tpu.memory_space<vmem>>, vector<1x32x256xf32>
    %24 = vector.shape_cast %23 : vector<1x32x256xf32> to vector<32x256xf32>
    %25 = vector.shape_cast %22 : vector<32x256xf32> to vector<1x32x256xf32>
    tpu.vector_store %arg6[%c0_15, %c0_16, %c0_17], %25 {strides = array<i32>} : memref<2x32x256xf32, #tpu.memory_space<vmem>>, vector<1x32x256xf32>,
    %c1 = arith.constant 1 : index
    %c0_18 = arith.constant 0 : index
    %c0_19 = arith.constant 0 : index
    %26 = vector.load %arg1[%c1, %c0_18, %c0_19] : memref<2x32x256xf32, #tpu.memory_space<vmem>>, vector<1x32x256xf32>
    %27 = vector.shape_cast %26 : vector<1x32x256xf32> to vector<32x256xf32>
    %cst_20 = arith.constant dense<0.000000e+00> : vector<32xf32>
    %28 = vector.multi_reduction <add>, %27, %cst_20 [1] : vector<32x256xf32> to vector<32xf32>
    %29 = vector.shape_cast %28 : vector<32xf32> to vector<32x1xf32>
    %cst_21 = arith.constant 3.906250e-03 : f32
    %30 = vector.broadcast %cst_21 : f32 to vector<32x1xf32>
    %31 = arith.mulf %29, %30 : vector<32x1xf32>
    %c0_22 = arith.constant 0 : index
    %c0_23 = arith.constant 0 : index
    %32 = vector.load %arg2[%c0_22, %c0_23] : memref<2x32xf32, #tpu.memory_space<vmem>>, vector<2x32xf32>
    %cst_24 = arith.constant dense<0.000000e+00> : vector<2x1xf32>
    %33 = tpu.matmul %32, %31, %cst_24 {dimension_numbers = #tpu.dot_dimension_numbers<[1], [0], [0], [1], [0, 0, 1, 1], [], []>} : vector<2x32xf32>, vector<32x1xf32>, vector<2x1xf32> -> vector<2x1xf32>
    %c0_25 = arith.constant 0 : index
    %c0_26 = arith.constant 0 : index
    %34 = vector.load %arg3[%c0_25, %c0_26] : memref<2x1xf32, #tpu.memory_space<vmem>>, vector<2x1xf32>
    %35 = arith.addf %33, %34 : vector<2x1xf32>
    %cst_27 = arith.constant 0.000000e+00 : f32
    %36 = vector.broadcast %cst_27 : f32 to vector<2x1xf32>
    %37 = arith.maximumf %35, %36 : vector<2x1xf32>
    %c0_28 = arith.constant 0 : index
    %c0_29 = arith.constant 0 : index
    %38 = vector.load %arg4[%c0_28, %c0_29] : memref<32x2xf32, #tpu.memory_space<vmem>>, vector<32x2xf32>
    %cst_30 = arith.constant dense<0.000000e+00> : vector<32x1xf32>
    %39 = tpu.matmul %38, %37, %cst_30 {dimension_numbers = #tpu.dot_dimension_numbers<[1], [0], [0], [1], [0, 0, 1, 1], [], []>} : vector<32x2xf32>, vector<2x1xf32>, vector<32x1xf32> -> vector<32x1xf32>
    %c0_31 = arith.constant 0 : index
    %c0_32 = arith.constant 0 : index
    %40 = vector.load %arg5[%c0_31, %c0_32] : memref<32x1xf32, #tpu.memory_space<vmem>>, vector<32x1xf32>
    %41 = arith.addf %39, %40 : vector<32x1xf32>
    %42 = arith.negf %41 : vector<32x1xf32>
    %43 = math.exp %42 : vector<32x1xf32>
    %cst_33 = arith.constant 1.000000e+00 : f32
    %44 = vector.broadcast %cst_33 : f32 to vector<32x1xf32>
    %45 = arith.addf %44, %43 : vector<32x1xf32>
    %46 = arith.divf %44, %45 : vector<32x1xf32>
    %47 = vector.broadcast %46 : vector<32x1xf32> to vector<32x256xf32>
    %48 = arith.mulf %27, %47 : vector<32x256xf32>
    %c1_34 = arith.constant 1 : index
    %c0_35 = arith.constant 0 : index
    %c0_36 = arith.constant 0 : index
    %49 = vector.load %arg6[%c1_34, %c0_35, %c0_36] : memref<2x32x256xf32, #tpu.memory_space<vmem>>, vector<1x32x256xf32>
    %50 = vector.shape_cast %49 : vector<1x32x256xf32> to vector<32x256xf32>
    %51 = vector.shape_cast %48 : vector<32x256xf32> to vector<1x32x256xf32>
    tpu.vector_store %arg6[%c1_34, %c0_35, %c0_36], %51 {strides = array<i32>} : memref<2x32x256xf32, #tpu.memory_space<vmem>>, vector<1x32x256xf32>,
    return
  }
  func.func @transform_0(%arg0: i32) -> (i32, i32, i32) {
    %c0_i32 = arith.constant 0 : i32
    %c0_i32_0 = arith.constant 0 : i32
    %c0_i32_1 = arith.constant 0 : i32
    return %arg0, %c0_i32, %c0_i32_0 : i32, i32, i32
  }
  func.func @transform_1(%arg0: i32) -> (i32, i32) {
    %c0_i32 = arith.constant 0 : i32
    %c0_i32_0 = arith.constant 0 : i32
    %c0_i32_1 = arith.constant 0 : i32
    return %c0_i32, %c0_i32_0 : i32, i32
  }
  func.func @transform_2(%arg0: i32) -> (i32, i32) {
    %c0_i32 = arith.constant 0 : i32
    %c0_i32_0 = arith.constant 0 : i32
    %c0_i32_1 = arith.constant 0 : i32
    return %c0_i32, %c0_i32_0 : i32, i32
  }
  func.func @transform_3(%arg0: i32) -> (i32, i32) {
    %c0_i32 = arith.constant 0 : i32
    %c0_i32_0 = arith.constant 0 : i32
    %c0_i32_1 = arith.constant 0 : i32
    return %c0_i32, %c0_i32_0 : i32, i32
  }
  func.func @transform_4(%arg0: i32) -> (i32, i32) {
    %c0_i32 = arith.constant 0 : i32
    %c0_i32_0 = arith.constant 0 : i32
    %c0_i32_1 = arith.constant 0 : i32
    return %c0_i32, %c0_i32_0 : i32, i32
  }
  func.func @transform_5(%arg0: i32) -> (i32, i32, i32) {
    %c0_i32 = arith.constant 0 : i32
    %c0_i32_0 = arith.constant 0 : i32
    %c0_i32_1 = arith.constant 0 : i32
    return %arg0, %c0_i32, %c0_i32_0 : i32, i32, i32
  }
}

</mosaic_0001>

<bundles_post_ra>
// kernel: tpu_custom_call.1
= control target key start
LH: loop header
LB: loop body
LE: loop exit
PB: predicated region body
PF: predicated region fallthrough
CT: control target
= control target key end

     0   :  { %10 = vsyncpa [#allocation3], 0  ;;  %s983_s0 = inlined_call_operand.hbm [shape: f32[2,32,256], index: 0, kind: input, shape index: {}]   ;;  %s984_s1 = inlined_call_operand.vmem [shape: f32[2,32], index: 1, kind: input, shape index: {}]   ;;  %s985_s2 = inlined_call_operand.vmem [shape: f32[2,1], index: 2, kind: input, shape index: {}]   ;;  %s986_s3 = inlined_call_operand.vmem [shape: f32[32,2], index: 3, kind: input, shape index: {}]   ;;  %s987_s4 = inlined_call_operand.vmem [shape: f32[32,1], index: 4, kind: input, shape index: {}]   ;;  %s988_s5 = inlined_call_operand.hbm [shape: f32[2,32,256], index: 5, kind: output, shape index: {}]  }
   0x1   :  { %11 = vsyncpa [#allocation4], 0  ;;  %s775_s18 = smov [#allocation2]   ;;  %s727_s22 = scalar_lea.hbm %s983_s0, 2048 }
   0x2   :  { %s17_s19 = sshll.u32 %s775_s18, 4  ;;  %p728_p0 = scmp.ne.s32.totalorder %s983_s0, %s727_s22  ;;  %s18_s19 = int_to_ptr.vmem [resolvable:$true] %s17_s19 }
   0x3   :  { %p731_p1 = scmp.lt.u32.totalorder %s727_s22, %s983_s0 }
   0x5   :  { %p733_p2 = pnand %p731_p1, %p728_p0 }
   0x7   :  { %736 = shalt.err (!%p733_p2)
}
   0x8   :  { %s737_s27 = scalar_lea.vmem %s18_s19, 2048  ;;  %p742_p4 = scmp.lt.s32.totalorder %s18_s19, %s18_s19 }
   0x9   :  { %p738_p3 = scmp.ne.s32.totalorder %s18_s19, %s737_s27  ;;  %p743_p5 = scmp.lt.s32.totalorder %s737_s27, %s737_s27 }
   0xb   :  { %p744_p6 = por %p743_p5, %p742_p4 }
   0xd   :  { %p745_p7 = pnand %p744_p6, %p738_p3 }
   0xf   :  { %748 = shalt.err (!%p745_p7)
}
  0x10   :  { %s776_s28 = smov 256   ;;  %s777_s29 = smov 16  }
  0x11   :  { %23 = dma.hbm_to_vmem [thread:$0]  %s983_s0, 2048, %s18_s19, [#allocation3], %s776_s28, %s776_s28, %s777_s29  }
  0x12   :  { %771 = dma.done.wait [#allocation3], 2048  }
  0x13   :  { %772 = vsyncadd [#allocation3], 4294965248  ;;  %v828_v0 = vld [vmem:[#allocation2 + $0x20] sm:$0xff]  ;;  %v830_v1 = vld [vmem:[#allocation2 + $0x28] sm:$0xff]  ;;  %v778_v12 = vmov 0.0|0.0   ;;  %vm779_vm0 = vmmov 0  }
  0x14   :  { %v832_v2 = vld [vmem:[#allocation2] sm:$0xff]  ;;  %v49_v3 = vadd.f32 %v830_v1, %v828_v0  ;;  %v836_v4 = vld [vmem:[#allocation2 + $0x8] sm:$0xff]  ;;  %v838_v5 = vld [vmem:[#allocation2 + $0x30] sm:$0xff]  ;;  %671 = vmatprep.subr.bf16.mxu0 %v778_v12  ;;  %v780_v13 = vmov 0.0   ;;  %vm61_vm1 = vcmask 261120   ;;  %vm144_vm2 = vcmask 15360  }
  0x15   :  { %v840_v6 = vld [vmem:[#allocation2 + $0x38] sm:$0xff]  ;;  %v43_v7 = vadd.f32 %v836_v4, %v832_v2  ;;  %v844_v8 = vld [vmem:[#allocation2 + $0x10] sm:$0xff]  ;;  %641 = vmatprep.mubr.msk.f32.mxu0 %vm779_vm0, %v780_v13  ;;  %v859_v16 = vld [vmem:[#allocation2 + $0x40] sm:$0xff]  ;;  %vm157_vm3 = vcmask 1041408   ;;  %v781_v57 = vmov 0  }
  0x16   :  { %v846_v9 = vld [vmem:[#allocation2 + $0x18] sm:$0xff]  ;;  %50 = vadd.xlane.f32.xlu1 %v49_v3  ;;  %v52_v10 = vadd.f32 %v840_v6, %v838_v5  ;;  %v855_v14 = vld [vmem:[#allocation2 + $0x50] sm:$0xff]  ;;  %v863_v18 = vld [vmem:[#allocation2 + $0x48] sm:$0xff]  ;;  %693 = vset.pattern.permute.xlu0 %v781_v57 }
  0x17   :  { %44 = vadd.xlane.f32.xlu0 %v43_v7  ;;  %v46_v11 = vadd.f32 %v846_v9, %v844_v8  ;;  %v857_v15 = vld [vmem:[#allocation2 + $0x58] sm:$0xff]  ;;  %v865_v19 = vld [vmem:[#allocation2 + $0x70] sm:$0xff]  ;;  %v315_v21 = vadd.f32 %v863_v18, %v859_v16  ;;  %v871_v22 = vld [vmem:[#allocation2 + $0x60] sm:$0xff]  ;;  %694 = vset.pattern.permute.xlu1 %v781_v57 }
  0x18   :  { %v318_v17 = vadd.f32 %v857_v15, %v855_v14  ;;  %v867_v20 = vld [vmem:[#allocation2 + $0x78] sm:$0xff]  ;;  %v873_v23 = vld [vmem:[#allocation2 + $0x68] sm:$0xff]  ;;  %v59_v36 = vld [vmem:[%s984_s1] sm:$0x3] }
  0x19   :  { %v324_v24 = vadd.f32 %v867_v20, %v865_v19  ;;  %v321_v25 = vadd.f32 %v873_v23, %v871_v22  ;;  %v136_v37 = vld [vmem:[%s986_s3] sm:$0xff]  ;;  %v137_v51 = vld [vmem:[%s986_s3 + $0x8] sm:$0xff]  ;;  %v138_v53 = vld [vmem:[%s986_s3 + $0x10] sm:$0xff] }
  0x1a   :  { %53 = vadd.xlane.f32.xlu1 %v52_v10  ;;  %646 = vmatprep.mubr.msk.f32.mxu1 %vm144_vm2, %v136_v37  ;;  %v60_v40 = vld [vmem:[%s985_s2] sm:$0x3]  ;;  %v139_v55 = vld [vmem:[%s986_s3 + $0x18] sm:$0xff]  ;;  %v918_v58 = vld [vmem:[%s987_s4 + $0x8] sm:$0xff] }
  0x1b   :  { %47 = vadd.xlane.f32.xlu0 %v46_v11  ;;  %v331_v56 = vld [vmem:[%s984_s1] sm:$0x3]  ;;  %v930_v3 = vld [vmem:[%s987_s4 + $0x18] sm:$0xff]  ;;  %v935_v10 = vld [vmem:[%s987_s4 + $0x10] sm:$0xff] }
  0x1c   :  { %v923_v59 = vld [vmem:[%s987_s4] sm:$0xff] }
  0x1e   :  { %319 = vadd.xlane.f32.xlu1 %v318_v17 }
  0x1f   :  { %316 = vadd.xlane.f32.xlu0 %v315_v21 }
  0x22   :  { %325 = vadd.xlane.f32.xlu1 %v324_v24  ;;  %v332_v24 = vld [vmem:[%s985_s2] sm:$0x3]  ;;  %s782_s2 = smov [#allocation5]  }
  0x23   :  { %322 = vadd.xlane.f32.xlu0 %v321_v25  ;;  %s581_s4 = sshll.u32 %s782_s2, 4  ;;  %s582_s4 = int_to_ptr.vmem [resolvable:$true] %s581_s4 }
  0x24   :  { %s749_s30 = scalar_lea.vmem %s582_s4, 2048  ;;  %p754_p9 = scmp.lt.s32.totalorder %s582_s4, %s582_s4 }
  0x25   :  { %p750_p8 = scmp.ne.s32.totalorder %s582_s4, %s749_s30  ;;  %p755_p10 = scmp.lt.s32.totalorder %s749_s30, %s749_s30 }
  0x27   :  { %p756_p11 = por %p755_p10, %p754_p9 }
  0x29   :  { %p757_p12 = pnand %p756_p11, %p750_p8 }
  0xa3   :  { %v51_v26 = vpop.xlane.xlu1 %50 }
  0xa4   :  { %v45_v27 = vpop.xlane.xlu0 %44  ;;  %v57_v32 = vmul.f32 0.00390625, %v51_v26 }
  0xa5   :  { %v55_v30 = vmul.f32 0.00390625, %v45_v27 }
  0xa7   :  { %v54_v28 = vpop.xlane.xlu1 %53 }
  0xa8   :  { %v48_v29 = vpop.xlane.xlu0 %47  ;;  %v58_v33 = vmul.f32 0.00390625, %v54_v28 }
  0xa9   :  { %v56_v31 = vmul.f32 0.00390625, %v48_v29 }
  0xaa   :  { %v675_v35 = vpack.c.bf16 %v58_v33, %v57_v32 }
  0xab   :  { %v672_v34 = vpack.c.bf16 %v56_v31, %v55_v30  ;;  %v320_v38 = vpop.xlane.xlu1 %319 }
  0xac   :  { %v317_v39 = vpop.xlane.xlu0 %316  ;;  %v328_v42 = vmul.f32 0.00390625, %v320_v38 }
  0xad   :  { %673 = vmatpush3.bf16.msra.mxu0 %v672_v34  ;;  %v327_v43 = vmul.f32 0.00390625, %v317_v39 }
  0xae   :  { %674 = vmatprep.subr.bf16.mxu0 %v778_v12 }
  0xaf   :  { %v326_v44 = vpop.xlane.xlu1 %325  ;;  %v678_v49 = vpack.c.bf16 %v328_v42, %v327_v43 }
  0xb0   :  { %v323_v47 = vpop.xlane.xlu0 %322  ;;  %v330_v50 = vmul.f32 0.00390625, %v326_v44 }
  0xb1   :  { %676 = vmatpush3.bf16.msra.mxu0 %v675_v35  ;;  %v329_v52 = vmul.f32 0.00390625, %v323_v47 }
  0xb3   :  { %v681_v54 = vpack.c.bf16 %v330_v50, %v329_v52 }
  0xb4   :  { %642 = vmatmul.mubr.msk.f32.vlgmr.msra.gmra.mrb[0].mxu0 %vm61_vm1, %v59_v36 }
  0xb5   :  { %665 = vmatprep.mubr.msk.f32.mxu0 %vm144_vm2, %v136_v37 }
 0x187   :  { %v131_v41 = vpop.f32.mrb[0].mxu0 }
 0x188   :  { %v132_v45 = vadd.f32 %v131_v41, %v60_v40  ;;  %v643_v46 = vpop.f32.mrb[1].mxu0 }
 0x18a   :  { %v135_v48 = vmax.f32 %v132_v45, 0.0 }
 0x18c   :  { %644 = vmatprep.subr.msk.mxu1 %vm157_vm3, %v135_v48 }
 0x18d   :  { %645 = vmatpush3.msk.msra.mxu1 %vm157_vm3, %v135_v48 }
 0x18e   :  { %647 = vmatmul.mubr.msk.f32.vlgmr.msra.gmra.mrb[0].mxu1 %vm144_vm2, %v137_v51  ;;  %677 = vmatprep.subr.bf16.mxu1 %v778_v12 }
 0x18f   :  { %679 = vmatpush3.bf16.msra.mxu1 %v678_v49  ;;  %649 = vmatprep.mubr.msk.f32.mxu1 %vm144_vm2, %v138_v53 }
 0x190   :  { %680 = vmatprep.subr.bf16.mxu1 %v778_v12 }
 0x192   :  { %650 = vmatmul.mubr.msk.f32.gmra.mrb[2].mxu1 %vm144_vm2, %v139_v55 }
 0x193   :  { %682 = vmatpush3.bf16.msra.mxu1 %v681_v54  ;;  %660 = vmatprep.mubr.msk.f32.mxu1 %vm779_vm0, %v780_v13 }
 0x196   :  { %661 = vmatmul.mubr.msk.f32.vlgmr.msra.gmra.mrb[4].mxu1 %vm61_vm1, %v331_v56 }
 0x197   :  { %668 = vmatprep.mubr.msk.f32.mxu1 %vm144_vm2, %v138_v53 }
 0x261   :  { %v648_v60 = vpop.f32.mrb[0].mxu1 }
 0x262   :  { %v233_v61 = vadd.f32 %v648_v60, %v918_v58  ;;  %v227_v62 = vpop.f32.mrb[1].mxu1 }
 0x263   :  { %v228_v63 = vadd.f32 %v227_v62, %v923_v59 }
 0x264   :  { %v600_v7 = vmul.f32 -1.442695, %v233_v61 }
 0x265   :  { %v599_v11 = vmul.f32 -1.442695, %v228_v63  ;;  %v651_v12 = vpop.f32.mrb[2].mxu1 }
 0x266   :  { %695 = vpow2.f32 %v600_v7  ;;  %v243_v13 = vadd.f32 %v651_v12, %v930_v3  ;;  %v237_v17 = vpop.f32.mrb[3].mxu1 }
 0x267   :  { %697 = vpow2.f32 %v599_v11  ;;  %v238_v21 = vadd.f32 %v237_v17, %v935_v10 }
 0x268   :  { %v602_v25 = vmul.f32 -1.442695, %v243_v13 }
 0x269   :  { %v601_v26 = vmul.f32 -1.442695, %v238_v21  ;;  %v402_v27 = vpop.f32.mrb[4].mxu1 }
 0x26a   :  { %699 = vpow2.f32 %v602_v25  ;;  %v403_v28 = vadd.f32 %v402_v27, %v332_v24  ;;  %v662_v29 = vpop.f32.mrb[5].mxu1 }
 0x26b   :  { %701 = vpow2.f32 %v601_v26 }
 0x26c   :  { %v406_v30 = vmax.f32 %v403_v28, 0.0 }
 0x26e   :  { %663 = vmatprep.subr.msk.mxu0 %vm157_vm3, %v406_v30  ;;  %683 = vmatprep.subr.msk.mxu1 %vm157_vm3, %v406_v30 }
 0x26f   :  { %664 = vmatpush3.msk.msra.mxu0 %vm157_vm3, %v406_v30  ;;  %684 = vmatpush3.msk.msra.mxu1 %vm157_vm3, %v406_v30 }
 0x270   :  { %v696_v31 = vpop.eup %695  ;;  %666 = vmatmul.mubr.msk.f32.vlgmr.msra.gmra.mrb[2].mxu0 %vm144_vm2, %v137_v51  ;;  %669 = vmatmul.mubr.msk.f32.vlgmr.msra.gmra.mrb[6].mxu1 %vm144_vm2, %v139_v55 }
 0x271   :  { %v698_v32 = vpop.eup %697  ;;  %v259_v33 = vadd.f32 1.0, %v696_v31 }
 0x272   :  { %v258_v34 = vadd.f32 1.0, %v698_v32 }
 0x273   :  { %703 = vrcp.f32 %v259_v33 }
 0x274   :  { %v700_v35 = vpop.eup %699  ;;  %705 = vrcp.f32 %v258_v34 }
 0x275   :  { %v702_v36 = vpop.eup %701  ;;  %v261_v37 = vadd.f32 1.0, %v700_v35 }
 0x276   :  { %v260_v38 = vadd.f32 1.0, %v702_v36 }
 0x277   :  { %707 = vrcp.f32 %v261_v37 }
 0x278   :  { %709 = vrcp.f32 %v260_v38 }
 0x27d   :  { %v704_v39 = vpop.eup %703 }
 0x27e   :  { %v706_v40 = vpop.eup %705  ;;  %277 = vperm.xlu1 %694, %v704_v39  }
 0x27f   :  { %272 = vperm.xlu0 %693, %v706_v40  }
 0x281   :  { %v708_v41 = vpop.eup %707 }
 0x282   :  { %287 = vperm.xlu1 %694, %v708_v41   ;;  %v710_v42 = vpop.eup %709 }
 0x286   :  { %282 = vperm.xlu1 %694, %v710_v42  }
 0x2fd   :  { %v278_v43 = vpop.permute.xlu1 %277 }
 0x2fe   :  { %v292_v44 = vmul.f32 %v278_v43, %v844_v8  ;;  %v293_v45 = vmul.f32 %v278_v43, %v846_v9  ;;  %v273_v46 = vpop.permute.xlu0 %272 }
 0x2ff   :  { %v290_v47 = vmul.f32 %v273_v46, %v832_v2  ;;  %v291_v48 = vmul.f32 %v273_v46, %v836_v4 }
 0x300   :  { %300 = vst [vmem:[#allocation5 + $0x10] sm:$0xff] %v292_v44  ;;  %301 = vst [vmem:[#allocation5 + $0x18] sm:$0xff] %v293_v45 }
 0x301   :  { %298 = vst [vmem:[#allocation5] sm:$0xff] %v290_v47  ;;  %299 = vst [vmem:[#allocation5 + $0x8] sm:$0xff] %v291_v48  ;;  %v288_v49 = vpop.permute.xlu1 %287 }
 0x302   :  { %v296_v50 = vmul.f32 %v288_v49, %v838_v5  ;;  %v297_v51 = vmul.f32 %v288_v49, %v840_v6 }
 0x304   :  { %304 = vst [vmem:[#allocation5 + $0x30] sm:$0xff] %v296_v50  ;;  %305 = vst [vmem:[#allocation5 + $0x38] sm:$0xff] %v297_v51 }
 0x305   :  { %v283_v52 = vpop.permute.xlu1 %282 }
 0x306   :  { %v294_v8 = vmul.f32 %v283_v52, %v828_v0  ;;  %v295_v9 = vmul.f32 %v283_v52, %v830_v1 }
 0x308   :  { %302 = vst [vmem:[#allocation5 + $0x20] sm:$0xff] %v294_v8  ;;  %303 = vst [vmem:[#allocation5 + $0x28] sm:$0xff] %v295_v9 }
 0x343   :  { %v667_v2 = vpop.f32.mrb[2].mxu0  ;;  %v670_v4 = vpop.f32.mrb[6].mxu1 }
 0x344   :  { %v502_v53 = vadd.f32 %v667_v2, %v918_v58  ;;  %v496_v54 = vpop.f32.mrb[3].mxu0  ;;  %v506_v55 = vpop.f32.mrb[7].mxu1  ;;  %v512_v0 = vadd.f32 %v670_v4, %v930_v3 }
 0x345   :  { %v497_v56 = vadd.f32 %v496_v54, %v923_v59  ;;  %v507_v5 = vadd.f32 %v506_v55, %v935_v10 }
 0x346   :  { %v610_v6 = vmul.f32 -1.442695, %v502_v53  ;;  %v612_v1 = vmul.f32 -1.442695, %v512_v0 }
 0x347   :  { %v609_v57 = vmul.f32 -1.442695, %v497_v56  ;;  %v611_v60 = vmul.f32 -1.442695, %v507_v5 }
 0x348   :  { %711 = vpow2.f32 %v610_v6 }
 0x349   :  { %713 = vpow2.f32 %v609_v57 }
 0x34a   :  { %715 = vpow2.f32 %v611_v60 }
 0x34b   :  { %717 = vpow2.f32 %v612_v1 }
 0x352   :  { %v712_v61 = vpop.eup %711 }
 0x353   :  { %v714_v62 = vpop.eup %713  ;;  %v528_v63 = vadd.f32 1.0, %v712_v61 }
 0x354   :  { %v716_v58 = vpop.eup %715  ;;  %v527_v7 = vadd.f32 1.0, %v714_v62 }
 0x355   :  { %719 = vrcp.f32 %v528_v63  ;;  %v529_v11 = vadd.f32 1.0, %v716_v58  ;;  %v718_v59 = vpop.eup %717 }
 0x356   :  { %721 = vrcp.f32 %v527_v7  ;;  %v530_v10 = vadd.f32 1.0, %v718_v59 }
 0x357   :  { %723 = vrcp.f32 %v529_v11 }
 0x358   :  { %725 = vrcp.f32 %v530_v10 }
 0x35f   :  { %v720_v12 = vpop.eup %719 }
 0x360   :  { %546 = vperm.xlu1 %694, %v720_v12   ;;  %v722_v13 = vpop.eup %721 }
 0x361   :  { %v724_v3 = vpop.eup %723 }
 0x362   :  { %v726_v17 = vpop.eup %725 }
 0x364   :  { %541 = vperm.xlu1 %694, %v722_v13  }
 0x368   :  { %551 = vperm.xlu1 %694, %v724_v3  }
 0x36c   :  { %556 = vperm.xlu1 %694, %v726_v17  }
 0x3df   :  { %v547_v21 = vpop.permute.xlu1 %546 }
 0x3e0   :  { %v561_v24 = vmul.f32 %v547_v21, %v855_v14  ;;  %v562_v25 = vmul.f32 %v547_v21, %v857_v15 }
 0x3e2   :  { %570 = vst [vmem:[#allocation5 + $0x50] sm:$0xff] %v561_v24  ;;  %571 = vst [vmem:[#allocation5 + $0x58] sm:$0xff] %v562_v25 }
 0x3e3   :  { %v542_v26 = vpop.permute.xlu1 %541 }
 0x3e4   :  { %v559_v27 = vmul.f32 %v542_v26, %v859_v16  ;;  %v560_v28 = vmul.f32 %v542_v26, %v863_v18 }
 0x3e6   :  { %568 = vst [vmem:[#allocation5 + $0x40] sm:$0xff] %v559_v27  ;;  %569 = vst [vmem:[#allocation5 + $0x48] sm:$0xff] %v560_v28 }
 0x3e7   :  { %v552_v29 = vpop.permute.xlu1 %551 }
 0x3e8   :  { %v563_v30 = vmul.f32 %v552_v29, %v871_v22  ;;  %v564_v31 = vmul.f32 %v552_v29, %v873_v23 }
 0x3ea   :  { %572 = vst [vmem:[#allocation5 + $0x60] sm:$0xff] %v563_v30  ;;  %573 = vst [vmem:[#allocation5 + $0x68] sm:$0xff] %v564_v31 }
 0x3eb   :  { %v557_v14 = vpop.permute.xlu1 %556 }
 0x3ec   :  { %v565_v15 = vmul.f32 %v557_v14, %v865_v19  ;;  %v566_v32 = vmul.f32 %v557_v14, %v867_v20 }
 0x3ee   :  { %574 = vst [vmem:[#allocation5 + $0x70] sm:$0xff] %v565_v15  ;;  %575 = vst [vmem:[#allocation5 + $0x78] sm:$0xff] %v566_v32 }
 0x3ef   :  { %760 = shalt.err (!%p757_p12)
}
 0x3f0   :  { %s761_s7 = scalar_lea.hbm %s988_s5, 2048 }
 0x3f1   :  { %p762_p13 = scmp.ne.s32.totalorder %s988_s5, %s761_s7  ;;  %p765_p0 = scmp.lt.u32.totalorder %s761_s7, %s988_s5 }
 0x3f3   :  { %p767_p1 = pnand %p765_p0, %p762_p13 }
 0x3f5   :  { %770 = shalt.err (!%p767_p1)
}
 0x3f6   :  { %587 = dma.vmem_to_hbm [thread:$0]  %s582_s4, 2048, %s988_s5, [#allocation4], %s776_s28, %s776_s28, %s777_s29  }
 0x3f7   :  { %773 = dma.done.wait [#allocation4], 2048  }
 0x3f8   :  { %774 = vsyncadd [#allocation4], 4294965248 }
 0x3f9   :  { %591 = vsyncpa [#allocation3], 1 }
 0x3fa   :  { %592 = vsyncpa [#allocation4], 1 }

</bundles_post_ra>
